<compile_context>
chip_gen: v7x
topology: tpu7x:2x2x1
jax: 0.10.0
libtpu: 0.0.40
codegen_flags: <defaults>
</compile_context>

<pallas_src>
import functools

import jax
import jax.numpy as jnp
from jax.experimental import pallas as pl
from jax.experimental.pallas import tpu as pltpu

IGNORE_INDEX = -100   # nn.NLLLoss default ignore_index
_VMEM_BUDGET = 20 * 1024 * 1024   # keep well under v7x's 32 MiB scoped limit


def _round_up(x: int, m: int) -> int:
    return -(-x // m) * m


def _pick_tile(S: int, H: int, O: int, tile_s: int) -> int:
    """Sequence-tile selection: lane-dense, v7x-dual-TC aware, VMEM-safe."""
    if S <= 128:
        # Single grid step; exact-ish 8-aligned extent for small sequences.
        return _round_up(S, 8)
    # Lane-dense tile (multiple of 128) no larger than requested / needed.
    tile = max(128, (min(tile_s, _round_up(S, 128)) // 128) * 128)
    # v7x has 2 TensorCores: keep >= 2 "parallel" grid steps when S allows so
    # the second core is not idle (no-op on single-TC v5e / v6e).
    tile = min(tile, max(128, _round_up(pl.cdiv(S, 2), 128)))

    # VMEM budget check (v7x: 64 MiB physical / 32 MiB default scoped); count
    # double buffering of every pipelined operand.  f32 activation tile is the
    # dominant term.
    def vmem_bytes(t: int) -> int:
        return 2 * (t * H * 4       # encoded tile (f32, double-buffered)
                    + O * t * 4     # logprobs tile (f32)
                    + O * H * 4     # resident weight
                    + t * 4         # targets row
                    + 128 * 4)      # partials row

    while tile > 128 and vmem_bytes(tile) > _VMEM_BUDGET:
        tile = max(128, ((tile // 2) // 128) * 128)
    return tile


def highlight_head_kernel(x_ref, w_ref, tgt_ref, logprobs_ref, partial_ref):
    # x: (TILE_S, H) native dtype ; w: (O, H) native dtype ; tgt: (1, TILE_S) i32
    # logprobs out: (O, TILE_S) f32 ; partial out: (1, 1, 128) f32
    #
    # Cast at the point of use: HBM is read once in the caller's dtype (no
    # wrapper pad/cast pass); the MXU sees bf16 with f32 accumulation.
    x = x_ref[...].astype(jnp.bfloat16)                            # (TILE_S, H)
    w = w_ref[...].astype(jnp.bfloat16)                            # (O, H)

    # logits_T[c, r] = sum_h w[c, h] * x[r, h]: both operands contract on their
    # last dim (MXU-native "A @ B^T" attention-score pattern) so the big
    # activation tile needs no XLU transpose; result keeps the sequence on
    # lanes for lane-dense stores and a cheap sublane-axis softmax.
    logits_t = jax.lax.dot_general(
        w, x, dimension_numbers=(((1,), (1,)), ((), ())),
        preferred_element_type=jnp.float32)                        # (O, TILE_S)

    # Log-softmax over the class axis (sublane axis 0), strictly f32.
    m = jnp.max(logits_t, axis=0, keepdims=True)                   # (1, TILE_S)
    shifted = logits_t - m
    lse = jnp.log(jnp.sum(jnp.exp(shifted), axis=0, keepdims=True))
    logprobs_t = shifted - lse                                     # (O, TILE_S)
    logprobs_ref[...] = logprobs_t                                 # lane-dense store

    # Masked NLL partials for this tile.  tgt already carries IGNORE_INDEX for
    # masked-out rows, sequence padding and ragged-tile lanes, so garbage
    # columns from an out-of-bounds activation read can never touch the loss.
    tgt = tgt_ref[...]                                             # (1, TILE_S)
    valid = tgt != jnp.int32(IGNORE_INDEX)                         # (1, TILE_S)
    o_rows, tile_s = logprobs_t.shape
    class_iota = jax.lax.broadcasted_iota(jnp.int32, (o_rows, tile_s), 0)
    onehot = (class_iota == tgt) & valid                           # (O, TILE_S)
    picked_sum = jnp.sum(jnp.where(onehot, logprobs_t, 0.0))       # scalar f32
    n_valid = jnp.sum(valid.astype(jnp.float32))                   # scalar f32

    # One aligned (1, 128) row of per-tile partials (lanes 0/1); keeps the grid
    # axis "parallel" (v7x dual-TC) with trivial writeback.
    lane = jax.lax.broadcasted_iota(jnp.int32, (1, 128), 1)
    partial_ref[0] = jnp.where(lane == 0, picked_sum,
                               jnp.where(lane == 1, n_valid, 0.0))


@functools.partial(jax.jit, static_argnames=("tile_s",))
def highlight_head_forward(encoded, weight, target, mask, *, tile_s=1024):
    """encoded: (S, H) float; weight: (O, H) (PyTorch nn.Linear layout);
    target, mask: (S,) int.  Returns (logprobs (S, O) f32, loss scalar f32)."""
    S, H = encoded.shape
    O = weight.shape[0]

    tile = _pick_tile(S, H, O, tile_s)
    grid = pl.cdiv(S, tile)
    s_pad = grid * tile

    # target' = where(mask == 1, target, ignore_index), lane-dense (1, s_pad);
    # sequence / ragged-tile padding also gets ignore_index.
    target_attn = jnp.where(mask.astype(jnp.int32) == 1,
                            target.astype(jnp.int32),
                            jnp.int32(IGNORE_INDEX))
    tgt = jnp.pad(target_attn, (0, s_pad - S),
                  constant_values=IGNORE_INDEX).reshape(1, s_pad)

    logprobs_t, partials = pl.pallas_call(
        highlight_head_kernel,
        grid=(grid,),
        out_shape=(
            jax.ShapeDtypeStruct((O, s_pad), jnp.float32),        # logprobs^T
            jax.ShapeDtypeStruct((grid, 1, 128), jnp.float32),    # per-tile partials
        ),
        in_specs=[
            pl.BlockSpec((tile, H), lambda i: (i, 0)),            # encoded tile (native dtype)
            pl.BlockSpec((O, H), lambda i: (0, 0)),               # weight, resident
            pl.BlockSpec((1, tile), lambda i: (0, i)),            # targets (lanes)
        ],
        out_specs=(
            pl.BlockSpec((O, tile), lambda i: (0, i)),
            pl.BlockSpec((1, 1, 128), lambda i: (i, 0, 0)),
        ),
        compiler_params=pltpu.CompilerParams(
            dimension_semantics=("parallel",),
            vmem_limit_bytes=32 * 1024 * 1024),
    )(encoded, weight, tgt)

    logprobs = jnp.transpose(logprobs_t[:, :S])                   # (S, O) f32
    picked_sum = jnp.sum(partials[:, 0, 0])
    n_valid = jnp.sum(partials[:, 0, 1])
    # Mean NLL over non-ignored rows (NaN if every row is ignored, matching
    # torch.nn.NLLLoss mean reduction semantics).
    loss = -picked_sum / n_valid
    return logprobs, loss


def _reference(encoded, weight, target, mask):
    # Same bf16-in / f32-accumulate numerics as the kernel.
    logits = jnp.einsum("sh,oh->so",
                        encoded.astype(jnp.bfloat16),
                        weight.astype(jnp.bfloat16),
                        preferred_element_type=jnp.float32)
    logprobs = jax.nn.log_softmax(logits, axis=1)
    target_attn = jnp.where(mask == 1, target, IGNORE_INDEX)
    valid = target_attn != IGNORE_INDEX
    picked = jnp.take_along_axis(
        logprobs, jnp.where(valid, target_attn, 0)[:, None], axis=1)[:, 0]
    loss = -jnp.sum(jnp.where(valid, picked, 0.0)) / jnp.sum(
        valid.astype(jnp.float32))
    return logprobs, loss


def _run_case(key, S, H, O, tile_s):
    k_enc, k_w, k_tgt, k_msk = jax.random.split(key, 4)
    encoded = jax.random.normal(k_enc, (S, H), dtype=jnp.float32)
    weight = (jax.random.normal(k_w, (O, H), dtype=jnp.float32)
              * (1.0 / jnp.sqrt(H)))                              # nn.Linear(H, O, bias=False)
    target = jax.random.randint(k_tgt, (S,), 0, O, dtype=jnp.int32)
    mask = jax.random.randint(k_msk, (S,), 0, 2, dtype=jnp.int32)
    mask = mask.at[0].set(1)                                      # >= 1 valid target

    logprobs, loss = highlight_head_forward(encoded, weight, target, mask,
                                            tile_s=tile_s)
    jax.block_until_ready((logprobs, loss))

    ref_lp, ref_loss = _reference(encoded, weight, target, mask)
    assert logprobs.shape == (S, O)
    assert jnp.allclose(logprobs, ref_lp, atol=2e-3, rtol=2e-3), (
        float(jnp.max(jnp.abs(logprobs - ref_lp))))
    assert jnp.allclose(loss, ref_loss, atol=2e-3, rtol=2e-3), (
        float(loss), float(ref_loss))


if __name__ == "__main__":
    # Small shapes implied by the forward: batch=1 squeezed away -> seq=8 tokens,
    # hidden_size=32, outdim=4.
    _run_case(jax.random.PRNGKey(0), S=8, H=32, O=4, tile_s=1024)
    # Multi-tile case: exercises grid > 1, the ragged last activation block and
    # the per-tile partials reduction.
    _run_case(jax.random.PRNGKey(1), S=300, H=128, O=4, tile_s=128)

    print("KERNEL_OK")
</pallas_src>

<mosaic_0001>
module attributes {stable_mosaic.version = 11 : i64} {
  func.func @highlight_head_kernel(%arg0: i32, %arg1: memref<8x32xf32, #tpu.memory_space<vmem>>, %arg2: memref<4x32xf32, #tpu.memory_space<vmem>>, %arg3: memref<1x8xi32, #tpu.memory_space<vmem>>, %arg4: memref<4x8xf32, #tpu.memory_space<vmem>>, %arg5: memref<1x1x128xf32, #tpu.memory_space<vmem>>) attributes {dimension_semantics = [#tpu.dimension_semantics<parallel>], iteration_bounds = array<i64: 1>, scalar_prefetch = 0 : i64, scratch_operands = 0 : i64, tpu.core_type = #tpu.core_type<tc>, window_params = [{transform_indices = @transform_0, window_bounds = array<i64: 8, 32>}, {pipeline_mode = #tpu.pipeline_mode<synchronous>, transform_indices = @transform_1, window_bounds = array<i64: 4, 32>}, {transform_indices = @transform_2, window_bounds = array<i64: 1, 8>}, {transform_indices = @transform_3, window_bounds = array<i64: 4, 8>}, {transform_indices = @transform_4, window_bounds = array<i64: 1, 1, 128>}]} {
    %c0 = arith.constant 0 : index
    %c0_0 = arith.constant 0 : index
    %0 = vector.load %arg1[%c0, %c0_0] : memref<8x32xf32, #tpu.memory_space<vmem>>, vector<8x32xf32>
    %1 = arith.truncf %0 : vector<8x32xf32> to vector<8x32xbf16>
    %c0_1 = arith.constant 0 : index
    %c0_2 = arith.constant 0 : index
    %2 = vector.load %arg2[%c0_1, %c0_2] : memref<4x32xf32, #tpu.memory_space<vmem>>, vector<4x32xf32>
    %3 = arith.truncf %2 : vector<4x32xf32> to vector<4x32xbf16>
    %cst = arith.constant dense<0.000000e+00> : vector<4x8xf32>
    %4 = tpu.matmul %3, %1, %cst {dimension_numbers = #tpu.dot_dimension_numbers<[1], [1], [0], [0], [0, 0, 1, 0], [], []>} : vector<4x32xbf16>, vector<8x32xbf16>, vector<4x8xf32> -> vector<4x8xf32>
    %cst_3 = arith.constant dense<0xFF800000> : vector<8xf32>
    %5 = vector.multi_reduction <maximumf>, %4, %cst_3 [0] : vector<4x8xf32> to vector<8xf32>
    %6 = vector.shape_cast %5 : vector<8xf32> to vector<1x8xf32>
    %7 = vector.broadcast %6 : vector<1x8xf32> to vector<4x8xf32>
    %8 = arith.subf %4, %7 : vector<4x8xf32>
    %9 = math.exp %8 : vector<4x8xf32>
    %cst_4 = arith.constant dense<0.000000e+00> : vector<8xf32>
    %10 = vector.multi_reduction <add>, %9, %cst_4 [0] : vector<4x8xf32> to vector<8xf32>
    %11 = vector.shape_cast %10 : vector<8xf32> to vector<1x8xf32>
    %12 = math.log %11 : vector<1x8xf32>
    %13 = vector.broadcast %12 : vector<1x8xf32> to vector<4x8xf32>
    %14 = arith.subf %8, %13 : vector<4x8xf32>
    %c0_5 = arith.constant 0 : index
    %c0_6 = arith.constant 0 : index
    %15 = vector.load %arg4[%c0_5, %c0_6] : memref<4x8xf32, #tpu.memory_space<vmem>>, vector<4x8xf32>
    tpu.vector_store %arg4[%c0_5, %c0_6], %14 {strides = array<i32>} : memref<4x8xf32, #tpu.memory_space<vmem>>, vector<4x8xf32>,
    %c0_7 = arith.constant 0 : index
    %c0_8 = arith.constant 0 : index
    %16 = vector.load %arg3[%c0_7, %c0_8] : memref<1x8xi32, #tpu.memory_space<vmem>>, vector<1x8xi32>
    %c-100_i32 = arith.constant -100 : i32
    %17 = vector.broadcast %c-100_i32 : i32 to vector<1x8xi32>
    %18 = arith.cmpi ne, %16, %17 : vector<1x8xi32>
    %19 = tpu.iota {dimensions = array<i32: 0>} : vector<4x8xi32>
    %20 = vector.broadcast %16 : vector<1x8xi32> to vector<4x8xi32>
    %21 = arith.cmpi eq, %19, %20 : vector<4x8xi32>
    %22 = vector.broadcast %18 : vector<1x8xi1> to vector<4x8xi1>
    %23 = arith.andi %21, %22 : vector<4x8xi1>
    %cst_9 = arith.constant 0.000000e+00 : f32
    %24 = vector.broadcast %cst_9 : f32 to vector<4x8xf32>
    %25 = arith.select %23, %14, %24 : vector<4x8xi1>, vector<4x8xf32>
    %26 = vector.shape_cast %25 : vector<4x8xf32> to vector<1x4x8xf32>
    %cst_10 = arith.constant dense<0.000000e+00> : vector<1xf32>
    %27 = vector.multi_reduction <add>, %26, %cst_10 [1, 2] : vector<1x4x8xf32> to vector<1xf32>
    %28 = vector.shape_cast %27 : vector<1xf32> to vector<1x1x1xf32>
    %29 = vector.extract %28[0, 0, 0] : f32 from vector<1x1x1xf32>
    %30 = arith.extui %18 : vector<1x8xi1> to vector<1x8xi32>
    %31 = arith.sitofp %30 : vector<1x8xi32> to vector<1x8xf32>
    %32 = vector.shape_cast %31 : vector<1x8xf32> to vector<1x1x8xf32>
    %cst_11 = arith.constant dense<0.000000e+00> : vector<1xf32>
    %33 = vector.multi_reduction <add>, %32, %cst_11 [1, 2] : vector<1x1x8xf32> to vector<1xf32>
    %34 = vector.shape_cast %33 : vector<1xf32> to vector<1x1x1xf32>
    %35 = vector.extract %34[0, 0, 0] : f32 from vector<1x1x1xf32>
    %36 = tpu.iota {dimensions = array<i32: 1>} : vector<1x128xi32>
    %c0_i32 = arith.constant 0 : i32
    %37 = vector.broadcast %c0_i32 : i32 to vector<1x128xi32>
    %38 = arith.cmpi eq, %36, %37 : vector<1x128xi32>
    %c1_i32 = arith.constant 1 : i32
    %39 = vector.broadcast %c1_i32 : i32 to vector<1x128xi32>
    %40 = arith.cmpi eq, %36, %39 : vector<1x128xi32>
    %cst_12 = arith.constant 0.000000e+00 : f32
    %41 = vector.broadcast %35 : f32 to vector<1x128xf32>
    %42 = vector.broadcast %cst_12 : f32 to vector<1x128xf32>
    %43 = arith.select %40, %41, %42 : vector<1x128xi1>, vector<1x128xf32>
    %44 = vector.broadcast %29 : f32 to vector<1x128xf32>
    %45 = arith.select %38, %44, %43 : vector<1x128xi1>, vector<1x128xf32>
    %c0_13 = arith.constant 0 : index
    %c0_14 = arith.constant 0 : index
    %c0_15 = arith.constant 0 : index
    %46 = vector.load %arg5[%c0_13, %c0_14, %c0_15] : memref<1x1x128xf32, #tpu.memory_space<vmem>>, vector<1x1x128xf32>
    %47 = vector.shape_cast %46 : vector<1x1x128xf32> to vector<1x128xf32>
    %48 = vector.shape_cast %45 : vector<1x128xf32> to vector<1x1x128xf32>
    tpu.vector_store %arg5[%c0_13, %c0_14, %c0_15], %48 {strides = array<i32>} : memref<1x1x128xf32, #tpu.memory_space<vmem>>, vector<1x1x128xf32>,
    return
  }
  func.func @transform_0(%arg0: i32) -> (i32, i32) {
    %c0_i32 = arith.constant 0 : i32
    %c0_i32_0 = arith.constant 0 : i32
    return %arg0, %c0_i32 : i32, i32
  }
  func.func @transform_1(%arg0: i32) -> (i32, i32) {
    %c0_i32 = arith.constant 0 : i32
    %c0_i32_0 = arith.constant 0 : i32
    %c0_i32_1 = arith.constant 0 : i32
    return %c0_i32, %c0_i32_0 : i32, i32
  }
  func.func @transform_2(%arg0: i32) -> (i32, i32) {
    %c0_i32 = arith.constant 0 : i32
    %c0_i32_0 = arith.constant 0 : i32
    return %c0_i32, %arg0 : i32, i32
  }
  func.func @transform_3(%arg0: i32) -> (i32, i32) {
    %c0_i32 = arith.constant 0 : i32
    %c0_i32_0 = arith.constant 0 : i32
    return %c0_i32, %arg0 : i32, i32
  }
  func.func @transform_4(%arg0: i32) -> (i32, i32, i32) {
    %c0_i32 = arith.constant 0 : i32
    %c0_i32_0 = arith.constant 0 : i32
    %c0_i32_1 = arith.constant 0 : i32
    return %arg0, %c0_i32, %c0_i32_0 : i32, i32, i32
  }
}

</mosaic_0001>

<bundles_post_ra>
// kernel: highlight_head_forward.1
= control target key start
LH: loop header
LB: loop body
LE: loop exit
PB: predicated region body
PF: predicated region fallthrough
CT: control target
= control target key end

     0   :  { %10 = vsyncpa [#allocation3], 0  ;;  %s308_s0 = inlined_call_operand.hbm [shape: f32[8,32], index: 0, kind: input, shape index: {}]   ;;  %s309_s1 = inlined_call_operand.vmem [shape: f32[4,32], index: 1, kind: input, shape index: {}]   ;;  %s310_s2 = inlined_call_operand.vmem [shape: s32[1,8], index: 2, kind: input, shape index: {}]   ;;  %s311_s3 = inlined_call_operand.hbm [shape: f32[4,8], index: 3, kind: output, shape index: {0}]   ;;  %s312_s4 = inlined_call_operand.vmem [shape: f32[1,1,128], index: 4, kind: output, shape index: {1}]  }
   0x1   :  { %11 = vsyncpa [#allocation4], 0  ;;  %s241_s15 = smov [#allocation2]   ;;  %s193_s19 = scalar_lea.hbm %s308_s0, 128 }
   0x2   :  { %s18_s16 = sshll.u32 %s241_s15, 4  ;;  %p194_p0 = scmp.ne.s32.totalorder %s308_s0, %s193_s19  ;;  %s19_s16 = int_to_ptr.vmem [resolvable:$true] %s18_s16 }
   0x3   :  { %p197_p1 = scmp.lt.u32.totalorder %s193_s19, %s308_s0 }
   0x5   :  { %p199_p2 = pnand %p197_p1, %p194_p0 }
   0x7   :  { %202 = shalt.err (!%p199_p2)
}
   0x8   :  { %s203_s24 = scalar_lea.vmem %s19_s16, 128  ;;  %p208_p4 = scmp.lt.s32.totalorder %s19_s16, %s19_s16 }
   0x9   :  { %p204_p3 = scmp.ne.s32.totalorder %s19_s16, %s203_s24  ;;  %p209_p5 = scmp.lt.s32.totalorder %s203_s24, %s203_s24 }
   0xb   :  { %p210_p6 = por %p209_p5, %p208_p4 }
   0xd   :  { %p211_p7 = pnand %p210_p6, %p204_p3 }
   0xf   :  { %214 = shalt.err (!%p211_p7)
}
  0x10   :  { %21 = dma.hbm_to_vmem [thread:$0]  %s308_s0, 128, %s19_s16, [#allocation3]  }
  0x11   :  { %237 = dma.done.wait [#allocation3], 128  }
  0x12   :  { %238 = vsyncadd [#allocation3], 4294967168  ;;  %v242_v0 = vmov 0.0   ;;  %vm243_vm0 = vmmov 0   ;;  %v30_v1 = vld [vmem:[#allocation2] sm:$0xff]  ;;  %vm34_vm1 = vcmask 261120   ;;  %v105_v24 = vlaneseq }
  0x13   :  { %174 = vmatprep.subr.bf16.mxu0 %v242_v0  ;;  %176 = vmatprep.mubr.msk.bf16.mxu0 %vm243_vm0, %v242_v0  ;;  %v31_v2 = vpack.c.bf16 %v30_v1, %v30_v1  ;;  %v32_v4 = vld [vmem:[%s309_s1] sm:$0xf]  ;;  %vm81_vm2 = vcmask 60416   ;;  %v244_v31 = vmov 0   ;;  %vm131_vm7 = vcmask 57344  }
  0x14   :  { %v33_v5 = vpack.c.bf16 %v32_v4, %v32_v4  ;;  %v103_v27 = vld [vmem:[%s310_s2] sm:$0x1]  ;;  %v106_v28 = vshrl.u32 %v105_v24, 7  ;;  %s245_s2 = smov [#allocation5]  }
  0x15   :  { %v39_v3 = vsel %vm34_vm1, %v31_v2, 0  ;;  %vm104_vm3 = vcmp.ne.s32.totalorder %v103_v27, 4294967196  ;;  %s157_s29 = sshll.u32 %s245_s2, 4  ;;  %s158_s29 = int_to_ptr.vmem [resolvable:$true] %s157_s29 }
  0x16   :  { %175 = vmatpush3.bf16.xpose.msra.mxu0 %v39_v3  ;;  %v109_v30 = vsub.s32 0, %v106_v28  ;;  %v112_v32 = vsel %vm104_vm3, 1, %v244_v31  ;;  %v171_v39 = vsel %vm104_vm3, 1.0, %v242_v0  ;;  %s215_s30 = scalar_lea.vmem %s158_s29, 64  ;;  %p220_p9 = scmp.lt.s32.totalorder %s158_s29, %s158_s29 }
  0x17   :  { %v132_v41 = vsel %vm131_vm7, %v171_v39, 0.0  ;;  %p216_p8 = scmp.ne.s32.totalorder %s158_s29, %s215_s30  ;;  %p221_p10 = scmp.lt.s32.totalorder %s215_s30, %s215_s30 }
  0x18   :  { %v110_v33 = vrot.slane %v103_v27, %v109_v30  ;;  %v116_v34 = vrot.slane %v112_v32, %v109_v30 }
  0x19   :  { %p222_p11 = por %p221_p10, %p220_p9 }
  0x1a   :  { %vm111_vm4 = vcmp.eq.s32.totalorder %v106_v28, %v110_v33  ;;  %vm117_vm5 = vcmp.eq.s32.totalorder %v116_v34, 1 }
  0x1b   :  { %vm118_vm6 = vmand %vm111_vm4, %vm117_vm5  ;;  %p223_p12 = pnand %p222_p11, %p216_p8 }
  0x1d   :  { %177 = vmatmul.mubr.msk.bf16.vlgmr.msra.gmra.mrb[0].mxu0 %vm34_vm1, %v33_v5 }
  0xf0   :  { %v75_v6 = vpop.f32.mrb[0].mxu0 }
  0xf1   :  { %v82_v7 = vsel %vm81_vm2, %v75_v6, -inf  ;;  %v178_v8 = vpop.f32.mrb[1].mxu0 }
  0xf2   :  { %v83_v9 = vrot.slane %v82_v7, 4  ;;  %v78_v10 = vpop.f32.mrb[2].mxu0 }
  0xf3   :  { %v179_v11 = vpop.f32.mrb[3].mxu0 }
  0xf4   :  { %v84_v12 = vmax.f32 %v82_v7, %v83_v9 }
  0xf6   :  { %v85_v13 = vrot.slane %v84_v12, 2 }
  0xf8   :  { %v86_v14 = vmax.f32 %v84_v12, %v85_v13 }
  0xfa   :  { %v87_v15 = vrot.slane %v86_v14, 1 }
  0xfc   :  { %v88_v16 = vmax.f32 %v86_v14, %v87_v15 }
  0xfe   :  { %v89_v17 = vsub.f32 %v75_v6, %v88_v16 }
 0x100   :  { %v90_v18 = vmul.f32 1.442695, %v89_v17 }
 0x102   :  { %189 = vpow2.f32 %v90_v18 }
 0x10c   :  { %v190_v19 = vpop.eup %189 }
 0x10d   :  { %v92_v20 = vsel %vm81_vm2, %v190_v19, 0.0 }
 0x10e   :  { %v93_v21 = vrot.slane %v92_v20, 4 }
 0x110   :  { %v94_v22 = vadd.f32 %v93_v21, %v92_v20 }
 0x112   :  { %v95_v23 = vrot.slane %v94_v22, 2 }
 0x114   :  { %v96_v25 = vadd.f32 %v95_v23, %v94_v22 }
 0x116   :  { %v97_v26 = vrot.slane %v96_v25, 1 }
 0x118   :  { %v98_v29 = vadd.f32 %v97_v26, %v96_v25 }
 0x11a   :  { %191 = vlog2.f32 %v98_v29 }
 0x124   :  { %v192_v35 = vpop.eup %191 }
 0x125   :  { %v100_v36 = vmul.f32 0.6931472, %v192_v35 }
 0x127   :  { %v101_v37 = vsub.f32 %v89_v17, %v100_v36 }
 0x129   :  { %v119_v38 = vsel %vm118_vm6, %v101_v37, 0.0  ;;  %102 = vst.msk [vmem:[#allocation5] sm:$0xf] %vm81_vm2, %v101_v37 }
 0x12a   :  { %v120_v40 = vsel %vm81_vm2, %v119_v38, 0.0 }
 0x12b   :  { %121 = vadd.xlane.f32.xlu0 %v120_v40 }
 0x12f   :  { %133 = vadd.xlane.f32.xlu0 %v132_v41 }
 0x130   :  { %226 = shalt.err (!%p223_p12)
}
 0x131   :  { %s227_s7 = scalar_lea.hbm %s311_s3, 64 }
 0x132   :  { %p228_p13 = scmp.ne.s32.totalorder %s311_s3, %s227_s7  ;;  %p231_p0 = scmp.lt.u32.totalorder %s227_s7, %s311_s3 }
 0x134   :  { %p233_p1 = pnand %p231_p0, %p228_p13 }
 0x136   :  { %236 = shalt.err (!%p233_p1)
}
 0x137   :  { %160 = dma.vmem_to_hbm [thread:$0]  %s158_s29, 64, %s311_s3, [#allocation4]   ;;  %v143_v56 = vand.u32 127, %v105_v24 }
 0x139   :  { %vm145_vm8 = vcmp.eq.s32.totalorder %v143_v56, 1  ;;  %vm144_vm9 = vcmp.eq.s32.totalorder %v143_v56, 0 }
 0x1b8   :  { %v122_v42 = vpop.xlane.xlu0 %121 }
 0x1b9   :  { %v123_v43 = vrot.slane %v122_v42, 4 }
 0x1bb   :  { %v124_v44 = vadd.f32 %v123_v43, %v122_v42 }
 0x1bc   :  { %v134_v45 = vpop.xlane.xlu0 %133 }
 0x1bd   :  { %v125_v46 = vrot.slane %v124_v44, 2  ;;  %v135_v47 = vrot.slane %v134_v45, 4 }
 0x1bf   :  { %v136_v48 = vadd.f32 %v135_v47, %v134_v45  ;;  %v126_v49 = vadd.f32 %v125_v46, %v124_v44 }
 0x1c1   :  { %v137_v50 = vrot.slane %v136_v48, 2  ;;  %v127_v51 = vrot.slane %v126_v49, 1 }
 0x1c3   :  { %v138_v52 = vadd.f32 %v137_v50, %v136_v48  ;;  %v128_v53 = vadd.f32 %v127_v51, %v126_v49 }
 0x1c5   :  { %180 = vpush %v128_v53  ;;  %v139_v54 = vrot.slane %v138_v52, 1 }
 0x1c7   :  { %v140_v55 = vadd.f32 %v139_v54, %v138_v52 }
 0x1c9   :  { %182 = vpush %v140_v55 }
 0x1f6   :  { %s181_s14 = spop %180 }
 0x1f7   :  { %v148_v58 = vstv %s181_s14 }
 0x1fa   :  { %s183_s3 = spop %182 }
 0x1fb   :  { %v146_v57 = vstv %s183_s3 }
 0x1fc   :  { %v147_v59 = vsel %vm145_vm8, %v146_v57, 0.0 }
 0x1fd   :  { %v149_v60 = vsel %vm144_vm9, %v148_v58, %v147_v59 }
 0x1fe   :  { %150 = vst [vmem:[%s312_s4] sm:$0x1] %v149_v60 }
 0x1ff   :  { %239 = dma.done.wait [#allocation4], 64  }
 0x200   :  { %240 = vsyncadd [#allocation4], 4294967232 }
 0x201   :  { %168 = vsyncpa [#allocation3], 1 }
 0x202   :  { %169 = vsyncpa [#allocation4], 1 }

</bundles_post_ra>
